<compile_context>
chip_gen: v5e
topology: v5e:2x2
jax: 0.10.0
libtpu: 0.0.40
codegen_flags: <defaults>
</compile_context>

<pallas_src>
from functools import partial

import jax
import jax.numpy as jnp
from jax import lax
from jax.experimental import pallas as pl
from jax.experimental.pallas import tpu as pltpu


# ------------------------------- kernel ------------------------------------ #

def _fused_mhsa_kernel(xsel_ref, wq_ref, wk_ref, wv_ref, wo_ref, sel_ref,
                       rbig_ref, maskc_ref, out_ref, *, num_heads):
    """One batch per grid step: projections + all heads + output projection."""
    neg = jnp.float32(-1000000.0)
    maskc = maskc_ref[...]                                   # (S, S): 1 keep / 0 mask
    acc = jnp.zeros(out_ref.shape, jnp.float32)              # (S, H)

    for n in range(num_heads):                               # static unroll (nh is tiny)
        xs = xsel_ref[n]                                     # (S, nh*H)
        # Per-head Q/K/V in the torch-reshaped layout, as plain matmuls.
        q = jnp.dot(xs, wq_ref[...], preferred_element_type=jnp.float32)   # (S, hd)
        k = jnp.dot(xs, wk_ref[...], preferred_element_type=jnp.float32)   # (S, hd)
        v = jnp.dot(xs, wv_ref[...], preferred_element_type=jnp.float32)   # (S, hd)

        # scores = Q @ K^T : contract last dims (no explicit transpose).
        scores = lax.dot_general(q, k, (((1,), (1,)), ((), ())),
                                 preferred_element_type=jnp.float32)       # (S, S)
        # Single combined masked_fill (replace with -1e6, exactly like torch).
        scores = jnp.where(maskc == 0, neg, scores)
        # Numerically stable softmax over the key axis.
        scores = scores - jnp.max(scores, axis=-1, keepdims=True)
        e = jnp.exp(scores)
        w = e * pl.reciprocal(jnp.sum(e, axis=-1, keepdims=True), approx=True)

        o = jnp.dot(w, v, preferred_element_type=jnp.float32)              # (S, hd)

        # Output projection in reshaped space: row r of head n multiplies
        # W_o rows [(r%nh)*hd : (r%nh+1)*hd]  -> select with the 0/1 parity mask.
        z = jnp.zeros(out_ref.shape, jnp.float32)                          # (S, H)
        for p in range(num_heads):
            z = z + sel_ref[p] * jnp.dot(o, wo_ref[p],
                                         preferred_element_type=jnp.float32)
        # Scatter-add (sum of the nh consecutive reshaped rows) into the
        # output row block of head n via the 0/1 matrix rbig[n].
        acc = acc + jnp.dot(rbig_ref[n], z, preferred_element_type=jnp.float32)

    out_ref[...] = acc


# ------------------------------- wrapper ----------------------------------- #

def _prepare_inputs(x, attention_mask, params, num_heads):
    B, S, H = x.shape
    nh = num_heads
    hd = H // nh
    Sc = S // nh
    f32 = jnp.float32

    # Fold the chained projection weights (X@Wq@Wqm == X@(Wq@Wqm)).
    wq_f = params["W_q"] @ params["W_q_m"]
    wk_f = params["W_k"] @ params["W_k_m"]
    wv_f = params["W_v"] @ params["W_v_m"]

    # Stack the per-parity column blocks of a folded weight row-wise:
    # w_big[p*H + h, d] = w[h, p*hd + d]
    def to_big(w):
        return w.reshape(H, nh, hd).transpose(1, 0, 2).reshape(nh * H, hd)

    wq_big, wk_big, wv_big = to_big(wq_f), to_big(wk_f), to_big(wv_f)
    wo_split = params["W_o"].reshape(nh, hd, H)              # wo_split[p] = W_o[p*hd:(p+1)*hd]

    # Expanded, parity-selected input:
    # xsel[b, n, r, p*H + h] = X[b, n*Sc + r//nh, h] * (r % nh == p)
    xg = jnp.repeat(x.reshape(B, nh, Sc, H), nh, axis=2)                    # (B, nh, S, H)
    pmask = (jnp.arange(S)[:, None] % nh == jnp.arange(nh)[None, :]).astype(f32)  # (S, nh)
    xsel = (xg[:, :, :, None, :] *
            pmask[None, None, :, :, None]).reshape(B, nh, S, nh * H)

    # Parity column mask: sel[p, r, 0] = (r % nh == p)
    sel = (jnp.arange(nh)[:, None] == jnp.arange(S)[None, :] % nh).astype(f32)[..., None]

    # Row scatter matrices: rbig[n, n*Sc + i, r] = (r // nh == i), else 0.
    n_i = jnp.arange(nh)[:, None, None]
    s_i = jnp.arange(S)[None, :, None]
    r_i = jnp.arange(S)[None, None, :]
    rbig = (((s_i // Sc) == n_i) & ((r_i // nh) == (s_i % Sc))).astype(f32)  # (nh, S, S)

    # Combined attention mask (== two torch masked_fill passes).
    maskc = jnp.logical_and(attention_mask[:, :, None] != 0,
                            attention_mask[:, None, :] != 0).astype(f32)     # (B, S, S)

    return xsel, wq_big, wk_big, wv_big, wo_split, sel, rbig, maskc


@partial(jax.jit, static_argnames=("num_heads",))
def mhsa_forward(x, attention_mask, params, num_heads=2):
    B, S, H = x.shape
    nh = num_heads
    hd = H // nh
    assert H % nh == 0 and S % nh == 0, "H and S must be divisible by num_heads"

    xsel, wq_big, wk_big, wv_big, wo_split, sel, rbig, maskc = _prepare_inputs(
        x, attention_mask, params, nh)

    out = pl.pallas_call(
        partial(_fused_mhsa_kernel, num_heads=nh),
        out_shape=jax.ShapeDtypeStruct((B, S, H), jnp.float32),
        grid=(B,),
        in_specs=[
            pl.BlockSpec((None, nh, S, nh * H), lambda b: (b, 0, 0, 0)),  # xsel
            pl.BlockSpec((nh * H, hd), lambda b: (0, 0)),                 # wq_big
            pl.BlockSpec((nh * H, hd), lambda b: (0, 0)),                 # wk_big
            pl.BlockSpec((nh * H, hd), lambda b: (0, 0)),                 # wv_big
            pl.BlockSpec((nh, hd, H), lambda b: (0, 0, 0)),               # wo_split
            pl.BlockSpec((nh, S, 1), lambda b: (0, 0, 0)),                # sel
            pl.BlockSpec((nh, S, S), lambda b: (0, 0, 0)),                # rbig
            pl.BlockSpec((None, S, S), lambda b: (b, 0, 0)),              # maskc
        ],
        out_specs=pl.BlockSpec((None, S, H), lambda b: (b, 0, 0)),
        compiler_params=pltpu.CompilerParams(
            dimension_semantics=("parallel",)),
    )(xsel, wq_big, wk_big, wv_big, wo_split, sel, rbig, maskc)
    return out


# --------------------------- pure-JAX reference ----------------------------- #

def reference(x, mask, p, num_heads=2):
    B, S, H = x.shape
    hd = H // num_heads
    Q = x @ p["W_q"]; K = x @ p["W_k"]; V = x @ p["W_v"]
    Qm = Q @ p["W_q_m"]; Km = K @ p["W_k_m"]; Vm = V @ p["W_v_m"]
    qs = Qm.reshape(B, num_heads, -1, hd)
    ks = Km.reshape(B, num_heads, -1, hd)
    vs = Vm.reshape(B, num_heads, -1, hd)
    sc = qs @ jnp.swapaxes(ks, -1, -2)
    m1 = mask[:, None, :, None]
    m2 = mask[:, None, None, :]
    sc = jnp.where(m1 == 0, -1000000.0, sc)
    sc = jnp.where(m2 == 0, -1000000.0, sc)
    w = jax.nn.softmax(sc, axis=-1)
    ao = (w @ vs).reshape(B, -1, H)
    return ao @ p["W_o"]


# --------------------------------- main ------------------------------------- #

if __name__ == "__main__":
    B, S = 2, 8
    H, NH = 6, 2          # hidden_size=6, num_heads=2 as in the PyTorch module

    key = jax.random.PRNGKey(0)
    keys = jax.random.split(key, 9)
    names = ["W_q", "W_k", "W_v", "W_q_m", "W_k_m", "W_v_m", "W_o"]
    params = {n: jax.random.normal(k, (H, H), jnp.float32) / 100.0
              for n, k in zip(names, keys[:7])}

    x = jax.random.normal(keys[7], (B, S, H), jnp.float32)
    attention_mask = jnp.ones((B, S), jnp.float32).at[1, -2:].set(0.0)

    out = mhsa_forward(x, attention_mask, params, num_heads=NH)
    out = jax.block_until_ready(out)

    ref = reference(x, attention_mask, params, num_heads=NH)
    assert out.shape == (B, S, H)
    assert jnp.allclose(out, ref, atol=1e-6, rtol=1e-3), "mismatch vs reference"
    print("KERNEL_OK")
</pallas_src>

<mosaic_0001>
module attributes {stable_mosaic.version = 11 : i64} {
  func.func @_fused_mhsa_kernel(%arg0: i32, %arg1: memref<1x2x8x12xf32, #tpu.memory_space<vmem>>, %arg2: memref<12x3xf32, #tpu.memory_space<vmem>>, %arg3: memref<12x3xf32, #tpu.memory_space<vmem>>, %arg4: memref<12x3xf32, #tpu.memory_space<vmem>>, %arg5: memref<2x3x6xf32, #tpu.memory_space<vmem>>, %arg6: memref<2x8x1xf32, #tpu.memory_space<vmem>>, %arg7: memref<2x8x8xf32, #tpu.memory_space<vmem>>, %arg8: memref<1x8x8xf32, #tpu.memory_space<vmem>>, %arg9: memref<1x8x6xf32, #tpu.memory_space<vmem>>) attributes {dimension_semantics = [#tpu.dimension_semantics<parallel>], iteration_bounds = array<i64: 2>, scalar_prefetch = 0 : i64, scratch_operands = 0 : i64, tpu.core_type = #tpu.core_type<tc>, window_params = [{transform_indices = @transform_0, window_bounds = array<i64: 1, 2, 8, 12>}, {pipeline_mode = #tpu.pipeline_mode<synchronous>, transform_indices = @transform_1, window_bounds = array<i64: 12, 3>}, {pipeline_mode = #tpu.pipeline_mode<synchronous>, transform_indices = @transform_2, window_bounds = array<i64: 12, 3>}, {pipeline_mode = #tpu.pipeline_mode<synchronous>, transform_indices = @transform_3, window_bounds = array<i64: 12, 3>}, {pipeline_mode = #tpu.pipeline_mode<synchronous>, transform_indices = @transform_4, window_bounds = array<i64: 2, 3, 6>}, {pipeline_mode = #tpu.pipeline_mode<synchronous>, transform_indices = @transform_5, window_bounds = array<i64: 2, 8, 1>}, {pipeline_mode = #tpu.pipeline_mode<synchronous>, transform_indices = @transform_6, window_bounds = array<i64: 2, 8, 8>}, {transform_indices = @transform_7, window_bounds = array<i64: 1, 8, 8>}, {transform_indices = @transform_8, window_bounds = array<i64: 1, 8, 6>}]} {
    %c0 = arith.constant 0 : index
    %c0_0 = arith.constant 0 : index
    %c0_1 = arith.constant 0 : index
    %0 = vector.load %arg8[%c0, %c0_0, %c0_1] : memref<1x8x8xf32, #tpu.memory_space<vmem>>, vector<1x8x8xf32>
    %1 = vector.shape_cast %0 : vector<1x8x8xf32> to vector<8x8xf32>
    %cst = arith.constant 0.000000e+00 : f32
    %2 = vector.broadcast %cst : f32 to vector<8x6xf32>
    %c0_2 = arith.constant 0 : index
    %c0_3 = arith.constant 0 : index
    %c0_4 = arith.constant 0 : index
    %c0_5 = arith.constant 0 : index
    %3 = vector.load %arg1[%c0_2, %c0_3, %c0_4, %c0_5] : memref<1x2x8x12xf32, #tpu.memory_space<vmem>>, vector<1x1x8x12xf32>
    %4 = vector.shape_cast %3 : vector<1x1x8x12xf32> to vector<8x12xf32>
    %c0_6 = arith.constant 0 : index
    %c0_7 = arith.constant 0 : index
    %5 = vector.load %arg2[%c0_6, %c0_7] : memref<12x3xf32, #tpu.memory_space<vmem>>, vector<12x3xf32>
    %cst_8 = arith.constant dense<0.000000e+00> : vector<8x3xf32>
    %6 = tpu.matmul %4, %5, %cst_8 {dimension_numbers = #tpu.dot_dimension_numbers<[1], [0], [0], [1], [0, 0, 1, 1], [], []>} : vector<8x12xf32>, vector<12x3xf32>, vector<8x3xf32> -> vector<8x3xf32>
    %c0_9 = arith.constant 0 : index
    %c0_10 = arith.constant 0 : index
    %7 = vector.load %arg3[%c0_9, %c0_10] : memref<12x3xf32, #tpu.memory_space<vmem>>, vector<12x3xf32>
    %cst_11 = arith.constant dense<0.000000e+00> : vector<8x3xf32>
    %8 = tpu.matmul %4, %7, %cst_11 {dimension_numbers = #tpu.dot_dimension_numbers<[1], [0], [0], [1], [0, 0, 1, 1], [], []>} : vector<8x12xf32>, vector<12x3xf32>, vector<8x3xf32> -> vector<8x3xf32>
    %c0_12 = arith.constant 0 : index
    %c0_13 = arith.constant 0 : index
    %9 = vector.load %arg4[%c0_12, %c0_13] : memref<12x3xf32, #tpu.memory_space<vmem>>, vector<12x3xf32>
    %cst_14 = arith.constant dense<0.000000e+00> : vector<8x3xf32>
    %10 = tpu.matmul %4, %9, %cst_14 {dimension_numbers = #tpu.dot_dimension_numbers<[1], [0], [0], [1], [0, 0, 1, 1], [], []>} : vector<8x12xf32>, vector<12x3xf32>, vector<8x3xf32> -> vector<8x3xf32>
    %cst_15 = arith.constant dense<0.000000e+00> : vector<8x8xf32>
    %11 = tpu.matmul %6, %8, %cst_15 {dimension_numbers = #tpu.dot_dimension_numbers<[1], [1], [0], [0], [0, 0, 1, 0], [], []>} : vector<8x3xf32>, vector<8x3xf32>, vector<8x8xf32> -> vector<8x8xf32>
    %cst_16 = arith.constant 0.000000e+00 : f32
    %12 = vector.broadcast %cst_16 : f32 to vector<8x8xf32>
    %13 = arith.cmpf oeq, %1, %12 : vector<8x8xf32>
    %cst_17 = arith.constant -1.000000e+06 : f32
    %14 = vector.broadcast %cst_17 : f32 to vector<8x8xf32>
    %15 = arith.select %13, %14, %11 : vector<8x8xi1>, vector<8x8xf32>
    %cst_18 = arith.constant dense<0xFF800000> : vector<8xf32>
    %16 = vector.multi_reduction <maximumf>, %15, %cst_18 [1] : vector<8x8xf32> to vector<8xf32>
    %17 = vector.shape_cast %16 : vector<8xf32> to vector<8x1xf32>
    %18 = vector.broadcast %17 : vector<8x1xf32> to vector<8x8xf32>
    %19 = arith.subf %15, %18 : vector<8x8xf32>
    %20 = math.exp %19 : vector<8x8xf32>
    %cst_19 = arith.constant dense<0.000000e+00> : vector<8xf32>
    %21 = vector.multi_reduction <add>, %20, %cst_19 [1] : vector<8x8xf32> to vector<8xf32>
    %22 = vector.shape_cast %21 : vector<8xf32> to vector<8x1xf32>
    %23 = tpu.reciprocal %22 {approx = true} : vector<8x1xf32> -> vector<8x1xf32>
    %24 = vector.broadcast %23 : vector<8x1xf32> to vector<8x8xf32>
    %25 = arith.mulf %20, %24 : vector<8x8xf32>
    %cst_20 = arith.constant dense<0.000000e+00> : vector<8x3xf32>
    %26 = tpu.matmul %25, %10, %cst_20 {dimension_numbers = #tpu.dot_dimension_numbers<[1], [0], [0], [1], [0, 0, 1, 1], [], []>} : vector<8x8xf32>, vector<8x3xf32>, vector<8x3xf32> -> vector<8x3xf32>
    %cst_21 = arith.constant 0.000000e+00 : f32
    %27 = vector.broadcast %cst_21 : f32 to vector<8x6xf32>
    %c0_22 = arith.constant 0 : index
    %c0_23 = arith.constant 0 : index
    %c0_24 = arith.constant 0 : index
    %28 = vector.load %arg6[%c0_22, %c0_23, %c0_24] : memref<2x8x1xf32, #tpu.memory_space<vmem>>, vector<1x8x1xf32>
    %29 = vector.shape_cast %28 : vector<1x8x1xf32> to vector<8x1xf32>
    %c0_25 = arith.constant 0 : index
    %c0_26 = arith.constant 0 : index
    %c0_27 = arith.constant 0 : index
    %30 = vector.load %arg5[%c0_25, %c0_26, %c0_27] : memref<2x3x6xf32, #tpu.memory_space<vmem>>, vector<1x3x6xf32>
    %31 = vector.shape_cast %30 : vector<1x3x6xf32> to vector<3x6xf32>
    %cst_28 = arith.constant dense<0.000000e+00> : vector<8x6xf32>
    %32 = tpu.matmul %26, %31, %cst_28 {dimension_numbers = #tpu.dot_dimension_numbers<[1], [0], [0], [1], [0, 0, 1, 1], [], []>} : vector<8x3xf32>, vector<3x6xf32>, vector<8x6xf32> -> vector<8x6xf32>
    %33 = vector.broadcast %29 : vector<8x1xf32> to vector<8x6xf32>
    %34 = arith.mulf %33, %32 : vector<8x6xf32>
    %35 = arith.addf %27, %34 : vector<8x6xf32>
    %c1 = arith.constant 1 : index
    %c0_29 = arith.constant 0 : index
    %c0_30 = arith.constant 0 : index
    %36 = vector.load %arg6[%c1, %c0_29, %c0_30] : memref<2x8x1xf32, #tpu.memory_space<vmem>>, vector<1x8x1xf32>
    %37 = vector.shape_cast %36 : vector<1x8x1xf32> to vector<8x1xf32>
    %c1_31 = arith.constant 1 : index
    %c0_32 = arith.constant 0 : index
    %c0_33 = arith.constant 0 : index
    %38 = vector.load %arg5[%c1_31, %c0_32, %c0_33] : memref<2x3x6xf32, #tpu.memory_space<vmem>>, vector<1x3x6xf32>
    %39 = vector.shape_cast %38 : vector<1x3x6xf32> to vector<3x6xf32>
    %cst_34 = arith.constant dense<0.000000e+00> : vector<8x6xf32>
    %40 = tpu.matmul %26, %39, %cst_34 {dimension_numbers = #tpu.dot_dimension_numbers<[1], [0], [0], [1], [0, 0, 1, 1], [], []>} : vector<8x3xf32>, vector<3x6xf32>, vector<8x6xf32> -> vector<8x6xf32>
    %41 = vector.broadcast %37 : vector<8x1xf32> to vector<8x6xf32>
    %42 = arith.mulf %41, %40 : vector<8x6xf32>
    %43 = arith.addf %35, %42 : vector<8x6xf32>
    %c0_35 = arith.constant 0 : index
    %c0_36 = arith.constant 0 : index
    %c0_37 = arith.constant 0 : index
    %44 = vector.load %arg7[%c0_35, %c0_36, %c0_37] : memref<2x8x8xf32, #tpu.memory_space<vmem>>, vector<1x8x8xf32>
    %45 = vector.shape_cast %44 : vector<1x8x8xf32> to vector<8x8xf32>
    %cst_38 = arith.constant dense<0.000000e+00> : vector<8x6xf32>
    %46 = tpu.matmul %45, %43, %cst_38 {dimension_numbers = #tpu.dot_dimension_numbers<[1], [0], [0], [1], [0, 0, 1, 1], [], []>} : vector<8x8xf32>, vector<8x6xf32>, vector<8x6xf32> -> vector<8x6xf32>
    %47 = arith.addf %2, %46 : vector<8x6xf32>
    %c0_39 = arith.constant 0 : index
    %c1_40 = arith.constant 1 : index
    %c0_41 = arith.constant 0 : index
    %c0_42 = arith.constant 0 : index
    %48 = vector.load %arg1[%c0_39, %c1_40, %c0_41, %c0_42] : memref<1x2x8x12xf32, #tpu.memory_space<vmem>>, vector<1x1x8x12xf32>
    %49 = vector.shape_cast %48 : vector<1x1x8x12xf32> to vector<8x12xf32>
    %c0_43 = arith.constant 0 : index
    %c0_44 = arith.constant 0 : index
    %50 = vector.load %arg2[%c0_43, %c0_44] : memref<12x3xf32, #tpu.memory_space<vmem>>, vector<12x3xf32>
    %cst_45 = arith.constant dense<0.000000e+00> : vector<8x3xf32>
    %51 = tpu.matmul %49, %50, %cst_45 {dimension_numbers = #tpu.dot_dimension_numbers<[1], [0], [0], [1], [0, 0, 1, 1], [], []>} : vector<8x12xf32>, vector<12x3xf32>, vector<8x3xf32> -> vector<8x3xf32>
    %c0_46 = arith.constant 0 : index
    %c0_47 = arith.constant 0 : index
    %52 = vector.load %arg3[%c0_46, %c0_47] : memref<12x3xf32, #tpu.memory_space<vmem>>, vector<12x3xf32>
    %cst_48 = arith.constant dense<0.000000e+00> : vector<8x3xf32>
    %53 = tpu.matmul %49, %52, %cst_48 {dimension_numbers = #tpu.dot_dimension_numbers<[1], [0], [0], [1], [0, 0, 1, 1], [], []>} : vector<8x12xf32>, vector<12x3xf32>, vector<8x3xf32> -> vector<8x3xf32>
    %c0_49 = arith.constant 0 : index
    %c0_50 = arith.constant 0 : index
    %54 = vector.load %arg4[%c0_49, %c0_50] : memref<12x3xf32, #tpu.memory_space<vmem>>, vector<12x3xf32>
    %cst_51 = arith.constant dense<0.000000e+00> : vector<8x3xf32>
    %55 = tpu.matmul %49, %54, %cst_51 {dimension_numbers = #tpu.dot_dimension_numbers<[1], [0], [0], [1], [0, 0, 1, 1], [], []>} : vector<8x12xf32>, vector<12x3xf32>, vector<8x3xf32> -> vector<8x3xf32>
    %cst_52 = arith.constant dense<0.000000e+00> : vector<8x8xf32>
    %56 = tpu.matmul %51, %53, %cst_52 {dimension_numbers = #tpu.dot_dimension_numbers<[1], [1], [0], [0], [0, 0, 1, 0], [], []>} : vector<8x3xf32>, vector<8x3xf32>, vector<8x8xf32> -> vector<8x8xf32>
    %cst_53 = arith.constant 0.000000e+00 : f32
    %57 = vector.broadcast %cst_53 : f32 to vector<8x8xf32>
    %58 = arith.cmpf oeq, %1, %57 : vector<8x8xf32>
    %cst_54 = arith.constant -1.000000e+06 : f32
    %59 = vector.broadcast %cst_54 : f32 to vector<8x8xf32>
    %60 = arith.select %58, %59, %56 : vector<8x8xi1>, vector<8x8xf32>
    %cst_55 = arith.constant dense<0xFF800000> : vector<8xf32>
    %61 = vector.multi_reduction <maximumf>, %60, %cst_55 [1] : vector<8x8xf32> to vector<8xf32>
    %62 = vector.shape_cast %61 : vector<8xf32> to vector<8x1xf32>
    %63 = vector.broadcast %62 : vector<8x1xf32> to vector<8x8xf32>
    %64 = arith.subf %60, %63 : vector<8x8xf32>
    %65 = math.exp %64 : vector<8x8xf32>
    %cst_56 = arith.constant dense<0.000000e+00> : vector<8xf32>
    %66 = vector.multi_reduction <add>, %65, %cst_56 [1] : vector<8x8xf32> to vector<8xf32>
    %67 = vector.shape_cast %66 : vector<8xf32> to vector<8x1xf32>
    %68 = tpu.reciprocal %67 {approx = true} : vector<8x1xf32> -> vector<8x1xf32>
    %69 = vector.broadcast %68 : vector<8x1xf32> to vector<8x8xf32>
    %70 = arith.mulf %65, %69 : vector<8x8xf32>
    %cst_57 = arith.constant dense<0.000000e+00> : vector<8x3xf32>
    %71 = tpu.matmul %70, %55, %cst_57 {dimension_numbers = #tpu.dot_dimension_numbers<[1], [0], [0], [1], [0, 0, 1, 1], [], []>} : vector<8x8xf32>, vector<8x3xf32>, vector<8x3xf32> -> vector<8x3xf32>
    %cst_58 = arith.constant 0.000000e+00 : f32
    %72 = vector.broadcast %cst_58 : f32 to vector<8x6xf32>
    %c0_59 = arith.constant 0 : index
    %c0_60 = arith.constant 0 : index
    %c0_61 = arith.constant 0 : index
    %73 = vector.load %arg6[%c0_59, %c0_60, %c0_61] : memref<2x8x1xf32, #tpu.memory_space<vmem>>, vector<1x8x1xf32>
    %74 = vector.shape_cast %73 : vector<1x8x1xf32> to vector<8x1xf32>
    %c0_62 = arith.constant 0 : index
    %c0_63 = arith.constant 0 : index
    %c0_64 = arith.constant 0 : index
    %75 = vector.load %arg5[%c0_62, %c0_63, %c0_64] : memref<2x3x6xf32, #tpu.memory_space<vmem>>, vector<1x3x6xf32>
    %76 = vector.shape_cast %75 : vector<1x3x6xf32> to vector<3x6xf32>
    %cst_65 = arith.constant dense<0.000000e+00> : vector<8x6xf32>
    %77 = tpu.matmul %71, %76, %cst_65 {dimension_numbers = #tpu.dot_dimension_numbers<[1], [0], [0], [1], [0, 0, 1, 1], [], []>} : vector<8x3xf32>, vector<3x6xf32>, vector<8x6xf32> -> vector<8x6xf32>
    %78 = vector.broadcast %74 : vector<8x1xf32> to vector<8x6xf32>
    %79 = arith.mulf %78, %77 : vector<8x6xf32>
    %80 = arith.addf %72, %79 : vector<8x6xf32>
    %c1_66 = arith.constant 1 : index
    %c0_67 = arith.constant 0 : index
    %c0_68 = arith.constant 0 : index
    %81 = vector.load %arg6[%c1_66, %c0_67, %c0_68] : memref<2x8x1xf32, #tpu.memory_space<vmem>>, vector<1x8x1xf32>
    %82 = vector.shape_cast %81 : vector<1x8x1xf32> to vector<8x1xf32>
    %c1_69 = arith.constant 1 : index
    %c0_70 = arith.constant 0 : index
    %c0_71 = arith.constant 0 : index
    %83 = vector.load %arg5[%c1_69, %c0_70, %c0_71] : memref<2x3x6xf32, #tpu.memory_space<vmem>>, vector<1x3x6xf32>
    %84 = vector.shape_cast %83 : vector<1x3x6xf32> to vector<3x6xf32>
    %cst_72 = arith.constant dense<0.000000e+00> : vector<8x6xf32>
    %85 = tpu.matmul %71, %84, %cst_72 {dimension_numbers = #tpu.dot_dimension_numbers<[1], [0], [0], [1], [0, 0, 1, 1], [], []>} : vector<8x3xf32>, vector<3x6xf32>, vector<8x6xf32> -> vector<8x6xf32>
    %86 = vector.broadcast %82 : vector<8x1xf32> to vector<8x6xf32>
    %87 = arith.mulf %86, %85 : vector<8x6xf32>
    %88 = arith.addf %80, %87 : vector<8x6xf32>
    %c1_73 = arith.constant 1 : index
    %c0_74 = arith.constant 0 : index
    %c0_75 = arith.constant 0 : index
    %89 = vector.load %arg7[%c1_73, %c0_74, %c0_75] : memref<2x8x8xf32, #tpu.memory_space<vmem>>, vector<1x8x8xf32>
    %90 = vector.shape_cast %89 : vector<1x8x8xf32> to vector<8x8xf32>
    %cst_76 = arith.constant dense<0.000000e+00> : vector<8x6xf32>
    %91 = tpu.matmul %90, %88, %cst_76 {dimension_numbers = #tpu.dot_dimension_numbers<[1], [0], [0], [1], [0, 0, 1, 1], [], []>} : vector<8x8xf32>, vector<8x6xf32>, vector<8x6xf32> -> vector<8x6xf32>
    %92 = arith.addf %47, %91 : vector<8x6xf32>
    %c0_77 = arith.constant 0 : index
    %c0_78 = arith.constant 0 : index
    %c0_79 = arith.constant 0 : index
    %93 = vector.load %arg9[%c0_77, %c0_78, %c0_79] : memref<1x8x6xf32, #tpu.memory_space<vmem>>, vector<1x8x6xf32>
    %94 = vector.shape_cast %93 : vector<1x8x6xf32> to vector<8x6xf32>
    %95 = vector.shape_cast %92 : vector<8x6xf32> to vector<1x8x6xf32>
    tpu.vector_store %arg9[%c0_77, %c0_78, %c0_79], %95 {strides = array<i32>} : memref<1x8x6xf32, #tpu.memory_space<vmem>>, vector<1x8x6xf32>,
    return
  }
  func.func @transform_0(%arg0: i32) -> (i32, i32, i32, i32) {
    %c0_i32 = arith.constant 0 : i32
    %c0_i32_0 = arith.constant 0 : i32
    %c0_i32_1 = arith.constant 0 : i32
    %c0_i32_2 = arith.constant 0 : i32
    return %arg0, %c0_i32, %c0_i32_0, %c0_i32_1 : i32, i32, i32, i32
  }
  func.func @transform_1(%arg0: i32) -> (i32, i32) {
    %c0_i32 = arith.constant 0 : i32
    %c0_i32_0 = arith.constant 0 : i32
    %c0_i32_1 = arith.constant 0 : i32
    return %c0_i32, %c0_i32_0 : i32, i32
  }
  func.func @transform_2(%arg0: i32) -> (i32, i32) {
    %c0_i32 = arith.constant 0 : i32
    %c0_i32_0 = arith.constant 0 : i32
    %c0_i32_1 = arith.constant 0 : i32
    return %c0_i32, %c0_i32_0 : i32, i32
  }
  func.func @transform_3(%arg0: i32) -> (i32, i32) {
    %c0_i32 = arith.constant 0 : i32
    %c0_i32_0 = arith.constant 0 : i32
    %c0_i32_1 = arith.constant 0 : i32
    return %c0_i32, %c0_i32_0 : i32, i32
  }
  func.func @transform_4(%arg0: i32) -> (i32, i32, i32) {
    %c0_i32 = arith.constant 0 : i32
    %c0_i32_0 = arith.constant 0 : i32
    %c0_i32_1 = arith.constant 0 : i32
    %c0_i32_2 = arith.constant 0 : i32
    return %c0_i32, %c0_i32_0, %c0_i32_1 : i32, i32, i32
  }
  func.func @transform_5(%arg0: i32) -> (i32, i32, i32) {
    %c0_i32 = arith.constant 0 : i32
    %c0_i32_0 = arith.constant 0 : i32
    %c0_i32_1 = arith.constant 0 : i32
    %c0_i32_2 = arith.constant 0 : i32
    return %c0_i32, %c0_i32_0, %c0_i32_1 : i32, i32, i32
  }
  func.func @transform_6(%arg0: i32) -> (i32, i32, i32) {
    %c0_i32 = arith.constant 0 : i32
    %c0_i32_0 = arith.constant 0 : i32
    %c0_i32_1 = arith.constant 0 : i32
    %c0_i32_2 = arith.constant 0 : i32
    return %c0_i32, %c0_i32_0, %c0_i32_1 : i32, i32, i32
  }
  func.func @transform_7(%arg0: i32) -> (i32, i32, i32) {
    %c0_i32 = arith.constant 0 : i32
    %c0_i32_0 = arith.constant 0 : i32
    %c0_i32_1 = arith.constant 0 : i32
    return %arg0, %c0_i32, %c0_i32_0 : i32, i32, i32
  }
  func.func @transform_8(%arg0: i32) -> (i32, i32, i32) {
    %c0_i32 = arith.constant 0 : i32
    %c0_i32_0 = arith.constant 0 : i32
    %c0_i32_1 = arith.constant 0 : i32
    return %arg0, %c0_i32, %c0_i32_0 : i32, i32, i32
  }
}

</mosaic_0001>

<bundles_post_ra>
// kernel: mhsa_forward.1
= control target key start
LH: loop header
LB: loop body
LE: loop exit
PB: predicated region body
PF: predicated region fallthrough
CT: control target
= control target key end

     0   :  { %s943_s27 = smov 0   ;;  %s1050_s0 = inlined_call_operand.vmem [shape: f32[2,2,8,12], index: 0, kind: input, shape index: {}]   ;;  %s1051_s1 = inlined_call_operand.vmem [shape: f32[12,3], index: 1, kind: input, shape index: {}]   ;;  %s1052_s2 = inlined_call_operand.vmem [shape: f32[12,3], index: 2, kind: input, shape index: {}]   ;;  %s1053_s3 = inlined_call_operand.vmem [shape: f32[12,3], index: 3, kind: input, shape index: {}]   ;;  %s1054_s4 = inlined_call_operand.vmem [shape: f32[2,3,6], index: 4, kind: input, shape index: {}]   ;;  %s1055_s5 = inlined_call_operand.vmem [shape: f32[2,8,1], index: 5, kind: input, shape index: {}]   ;;  %s1056_s6 = inlined_call_operand.vmem [shape: f32[2,8,8], index: 6, kind: input, shape index: {}]   ;;  %s1057_s7 = inlined_call_operand.vmem [shape: f32[2,8,8], index: 7, kind: input, shape index: {}]   ;;  %s1058_s8 = inlined_call_operand.vmem [shape: f32[2,8,6], index: 8, kind: output, shape index: {}]  }
   0x1 LB: > { %s826_s28 = sadd.s32 4294967295, %s895_s27   ;;  %p830_p0 = scmp.ge.s32.totalorder %s895_s27, 1  ;;  %s895_s27 = sphi %s943_s27, %s18_s27  }
   0x2   : > { %p271_p1 = scmp.lt.s32.totalorder %s895_s27, 3 }
   0x4   : > { %p272_p2 = pnand %p830_p0, %p271_p1 }
   0x5   : > { %p308_p3 = scmp.lt.s32.totalorder (!%p272_p2), %s826_s28, 1 }
   0x6   : > { %275 = sbr.rel (%p272_p2) target bundleno = 1453 (0x5ad), region = 52 }
   0xb   : > { %vm329_vm0 = vcmask 1043456   ;;  %v354_v0 = vld [vmem:[%s1052_s2 + $0x8] sm:$0xf]  ;;  %v353_v1 = vld [vmem:[%s1052_s2] sm:$0xff]  ;;  %s1060_s28 = smov (!%p308_p3, %s826_s28), 1  ;;  %vm325_vm1 = vcmask 97280  }
   0xc   : > { %v324_v2 = vld [vmem:[%s1051_s1 + $0x8] sm:$0xf]  ;;  %837 = vmatpush.msk.msra.mxu1 %vm329_vm0, %v354_v0  ;;  %v323_v3 = vld [vmem:[%s1051_s1] sm:$0xff]  ;;  %s869_s15 = sshll.u32 %s1060_s28, 4  ;;  %vm403_vm2 = vcmask 23552   ;;  %s833_s19 = sshll.u32 %s1060_s28, 3 }
   0xd   : > { %835 = vmatpush.msk.msra.mxu0 %vm329_vm0, %v324_v2  ;;  %s971_s18 = scalar_lea.vmem %s1050_s0, %s869_s15  ;;  %s316_s22 = scalar_lea.vmem %s1057_s7, %s833_s19  ;;  %vm432_vm4 = vcmask 64512   ;;  %v379_v11 = vld [vmem:[%s1053_s3 + $0x8] sm:$0xf]  ;;  %v378_v12 = vld [vmem:[%s1053_s3] sm:$0xff]  ;;  %vm472_vm5 = vcmask 1042432   ;;  %v897_v26 = vmov 0  }
   0xe   : > { %373 = vmatpush.msra.mxu1 %v353_v1  ;;  %v322_v4 = vld [vmem:[%s971_s18] sm:$0xff]  ;;  %839 = vmatpush.msk.msra.mxu2 %vm329_vm0, %v379_v11  ;;  %v850_v19 = vld [vmem:[%s971_s18 + $0x8] sm:$0xff]  ;;  %vm759_vm6 = vcmask 48128  }
   0xf   : > { %348 = vmatpush.msra.mxu0 %v323_v3  ;;  %838 = vmatmul.msk.f32.vlgmr.msra.gmra.mxu1 %vm325_vm1, %v322_v4  ;;  %v985_v7 = vld [vmem:[%s316_s22] sm:$0xff]  ;;  %v846_v27 = vld [vmem:[%s1055_s5 + $0x8] sm:$0xff]  ;;  %s320_s22 = scalar_lea.vmem %s1058_s8, %s833_s19 }
  0x10   : > { %836 = vmatmul.msk.f32.vlgmr.msra.gmra.mxu0 %vm325_vm1, %v322_v4  ;;  %vm430_vm3 = vcmp.eq.f32.partialorder %v985_v7, 0.0  ;;  %398 = vmatpush.msra.mxu2 %v378_v12  ;;  %v468_v23 = vld [vmem:[%s1054_s4] sm:$0x7]  ;;  %v847_v24 = vld [vmem:[%s1054_s4 + $0x4] sm:$0x7]  ;;  %v864_v57 = vld [vmem:[%s1056_s6 + $0x8] sm:$0xff] }
  0x11   : > { %840 = vmatmul.msk.f32.vlgmr.msra.gmra.mxu2 %vm325_vm1, %v322_v4  ;;  %844 = vmatpush.msk.msrb.mxu1 %vm472_vm5, %v468_v23  ;;  %v467_v25 = vld [vmem:[%s1055_s5] sm:$0xff] }
  0x12   : > { %848 = vmatpush.msk.msrb.mxu2 %vm472_vm5, %v847_v24  ;;  %879 = vset.pattern.permute.xlu2 %v897_v26  ;;  %v537_v51 = vld [vmem:[%s1056_s6] sm:$0xff] }
  0x13   : > { %855 = vmatpush.msk.msra.mxu1 %vm329_vm0, %v379_v11  ;;  %880 = vset.pattern.permute.xlu0 %v897_v26 }
  0x14   : > { %498 = vperm.xlu2 %879, %v467_v25  }
  0x15   : > { %598 = vmatpush.msra.mxu1 %v378_v12 }
  0x1c   : > { %532 = vperm.xlu2 %879, %v846_v27  }
  0x6e   : > { %v499_v31 = vpop.permute.xlu2 %498 }
  0x76   : > { %v533_v33 = vpop.permute.xlu2 %532 }
  0x8c   : > { %v375_v5 = vpop.f32.mrf.mxu1 }
  0x8d   : > { %841 = vmatpush.xpose.msk.msra.mxu3 %vm403_vm2, %v375_v5  ;;  %v350_v6 = vpop.f32.mrf.mxu0 }
  0x90   : > { %842 = vmatmul.msk.f32.vlgmr.msra.gmra.mxu3 %vm403_vm2, %v350_v6 }
  0x91   : > { %851 = vmatpush.msk.msrb.mxu3 %vm329_vm0, %v324_v2 }
  0x93   : > { %558 = vmatpush.msrb.mxu3 %v323_v3 }
  0x94   : > { %v400_v18 = vpop.f32.mrf.mxu2 }
  0x95   : > { %462 = vmatpush.msrb.mxu0 %v400_v18 }
  0x97   : > { %853 = vmatpush.msk.msra.mxu0 %vm329_vm0, %v354_v0 }
  0x98   : > { %852 = vmatmul.msk.f32.vlgmr.msrb.gmra.mxu3 %vm325_vm1, %v850_v19 }
  0x99   : > { %578 = vmatpush.msra.mxu0 %v353_v1 }
 0x113   : > { %v427_v8 = vpop.f32.mrf.mxu3 }
 0x114   : > { %v431_v9 = vsel %vm430_vm3, -1000000.0, %v427_v8 }
 0x115   : > { %v433_v10 = vsel %vm432_vm4, %v431_v9, -inf }
 0x116   : > { %434 = vmax.xlane.f32.xlu0 %v433_v10 }
 0x11b   : > { %v560_v30 = vpop.f32.mrf.mxu3 }
 0x189   : > { %v435_v13 = vpop.xlane.xlu0 %434 }
 0x18a   : > { %v436_v14 = vsub.f32 %v431_v9, %v435_v13 }
 0x18c   : > { %v437_v15 = vmul.f32 1.442695, %v436_v14 }
 0x18e   : > { %881 = vpow2.f32 %v437_v15 }
 0x194   : > { %v882_v16 = vpop.eup %881 }
 0x195   : > { %v439_v17 = vsel %vm432_vm4, %v882_v16, 0.0 }
 0x196   : > { %440 = vadd.xlane.f32.xlu0 %v439_v17 }
 0x209   : > { %v441_v20 = vpop.xlane.xlu0 %440 }
 0x20a   : > { %883 = vrcp.f32 %v441_v20 }
 0x210   : > { %v884_v21 = vpop.eup %883 }
 0x211   : > { %v443_v22 = vmul.f32 %v884_v21, %v882_v16 }
 0x213   : > { %843 = vmatmul.msk.f32.vlgmr.msrb.gmra.mxu0 %vm432_vm4, %v443_v22 }
 0x214   : > { %860 = vmatpush.msk.msrb.mxu0 %vm472_vm5, %v468_v23 }
 0x21b   : > { %854 = vmatmul.msk.f32.vlgmr.msra.gmra.mxu0 %vm325_vm1, %v850_v19 }
 0x290   : > { %v464_v28 = vpop.f32.mrf.mxu0 }
 0x291   : > { %845 = vmatmul.msk.f32.vlgmr.msrb.gmra.mxu1 %vm403_vm2, %v464_v28  ;;  %849 = vmatmul.msk.f32.vlgmr.msrb.gmra.mxu2 %vm403_vm2, %v464_v28 }
 0x292   : > { %862 = vmatpush.msk.msrb.mxu1 %vm472_vm5, %v847_v24 }
 0x298   : > { %v580_v29 = vpop.f32.mrf.mxu0 }
 0x299   : > { %857 = vmatpush.xpose.msk.msra.mxu2 %vm403_vm2, %v580_v29  ;;  %856 = vmatmul.msk.f32.vlgmr.msra.gmra.mxu1 %vm325_vm1, %v850_v19 }
 0x29c   : > { %858 = vmatmul.msk.f32.vlgmr.msra.gmra.mxu2 %vm403_vm2, %v560_v30 }
 0x30e   : > { %v493_v32 = vpop.f32.mrf.mxu1 }
 0x30f   : > { %v501_v35 = vmul.f32 %v499_v31, %v493_v32 }
 0x314   : > { %v527_v34 = vpop.f32.mrf.mxu2 }
 0x315   : > { %v535_v36 = vmul.f32 %v533_v33, %v527_v34 }
 0x316   : > { %v600_v37 = vpop.f32.mrf.mxu1 }
 0x317   : > { %v536_v38 = vadd.f32 %v535_v36, %v501_v35  ;;  %659 = vmatpush.msra.mxu3 %v600_v37 }
 0x319   : > { %754 = vmatpush.msrb.mxu3 %v536_v38 }
 0x31f   : > { %v626_v39 = vpop.f32.mrf.mxu2 }
 0x320   : > { %v629_v40 = vsel %vm430_vm3, -1000000.0, %v626_v39 }
 0x321   : > { %v630_v41 = vsel %vm432_vm4, %v629_v40, -inf }
 0x322   : > { %631 = vmax.xlane.f32.xlu1 %v630_v41 }
 0x395   : > { %v632_v42 = vpop.xlane.xlu1 %631 }
 0x396   : > { %v633_v43 = vsub.f32 %v629_v40, %v632_v42 }
 0x398   : > { %v634_v44 = vmul.f32 1.442695, %v633_v43 }
 0x39a   : > { %885 = vpow2.f32 %v634_v44 }
 0x3a0   : > { %v886_v45 = vpop.eup %885 }
 0x3a1   : > { %v636_v46 = vsel %vm432_vm4, %v886_v45, 0.0 }
 0x3a2   : > { %637 = vadd.xlane.f32.xlu1 %v636_v46 }
 0x415   : > { %v638_v47 = vpop.xlane.xlu1 %637 }
 0x416   : > { %887 = vrcp.f32 %v638_v47 }
 0x41c   : > { %v888_v48 = vpop.eup %887 }
 0x41d   : > { %v640_v49 = vmul.f32 %v888_v48, %v886_v45 }
 0x41f   : > { %859 = vmatmul.msk.f32.vlgmr.msra.gmra.mxu3 %vm432_vm4, %v640_v49 }
 0x427   : > { %866 = vmatmul.msk.f32.vlgmr.msrb.gmra.mxu3 %vm432_vm4, %v537_v51 }
 0x4a2   : > { %v661_v50 = vpop.f32.mrf.mxu3 }
 0x4a3   : > { %861 = vmatmul.msk.f32.vlgmr.msrb.gmra.mxu0 %vm403_vm2, %v661_v50  ;;  %863 = vmatmul.msk.f32.vlgmr.msrb.gmra.mxu1 %vm403_vm2, %v661_v50 }
 0x4aa   : > { %v756_v58 = vpop.f32.mrf.mxu3 }
 0x520   : > { %v684_v52 = vpop.f32.mrf.mxu0  ;;  %v706_v53 = vpop.f32.mrf.mxu1 }
 0x521   : > { %v687_v54 = vmul.f32 %v684_v52, %v499_v31  ;;  %v709_v55 = vmul.f32 %v706_v53, %v533_v33 }
 0x523   : > { %v710_v56 = vadd.f32 %v709_v55, %v687_v54 }
 0x525   : > { %731 = vmatpush.msrb.mxu2 %v710_v56 }
 0x526   : > { %865 = vmatmul.msk.f32.vlgmr.msrb.gmra.mxu2 %vm432_vm4, %v864_v57 }
 0x5a9   : > { %v733_v59 = vpop.f32.mrf.mxu2 }
 0x5aa   : > { %v757_v60 = vadd.f32 %v756_v58, %v733_v59 }
 0x5ac   : > { %760 = vst.msk [vmem:[%s320_s22] sm:$0xff] %vm759_vm6, %v757_v60 }
 0x5ad PF: > { %s18_s27 = sadd.s32 1, %s895_s27  }
 0x5ae   : > { %p15_p4 = scmp.ge.s32.totalorder %s18_s27, 4  }
 0x5b0   :  { %17 = sbr.rel (!%p15_p4) target bundleno = 1 (0x1), region = 89 }

</bundles_post_ra>
